<compile_context>
chip_gen: v7x
topology: tpu7x:2x2x1
jax: 0.10.0
libtpu: 0.0.40
codegen_flags: <defaults>
</compile_context>

<pallas_src>
import functools

import jax
import jax.numpy as jnp
from jax.experimental import pallas as pl
from jax.experimental.pallas import tpu as pltpu

BN_EPS = 1e-5
TILE_N_MAX = 4096  # rows per tile; multiple of 8, cheap in bytes for small cin/cout


def _round_up(x, m):
    return (x + m - 1) // m * m


def _matmul_stats_kernel(x_ref, w_ref, h_ref, stats_ref):
    """Phase 1: h = x @ W per tile; accumulate sum(h), sum(h*h) across tiles."""
    i = pl.program_id(0)

    # MXU matmul, bf16 inputs, f32 accumulation.
    h = jnp.dot(x_ref[...], w_ref[...], preferred_element_type=jnp.float32)
    h_ref[...] = h

    tile_sum = jnp.sum(h, axis=0, keepdims=True)          # (1, cout)
    tile_sumsq = jnp.sum(h * h, axis=0, keepdims=True)    # (1, cout)

    @pl.when(i == 0)
    def _():
        stats_ref[...] = jnp.zeros_like(stats_ref)

    # stats_ref is VMEM-resident across the whole grid (constant index_map).
    stats_ref[...] += jnp.concatenate([tile_sum, tile_sumsq], axis=0)


def _bn_relu_kernel(stats_ref, gamma_ref, beta_ref, h_ref, o_ref, *, inv_n):
    """Phase 2: y = relu((h - mean) * inv_std * gamma + beta), folded to one FMA."""
    stats = stats_ref[...]                     # (2, cout) f32
    mean = stats[0:1, :] * inv_n               # E[h]
    var = stats[1:2, :] * inv_n - mean * mean  # biased variance (one-pass)
    inv_std = jax.lax.rsqrt(var + BN_EPS)      # EUP
    scale = gamma_ref[...] * inv_std
    shift = beta_ref[...] - mean * scale
    o_ref[...] = jnp.maximum(h_ref[...] * scale + shift, 0.0)


@jax.jit
def fcn_forward(x, weight, bias, gamma, beta):
    """x: (kk, t, cin) -> (kk, t, cout). weight: (cout, cin) (PyTorch layout)."""
    del bias  # cancels exactly under training-mode BatchNorm (mean subtraction)

    kk, t, cin = x.shape
    cout = weight.shape[0]
    n = kk * t

    tile_n = min(TILE_N_MAX, _round_up(n, 8))
    n_pad = _round_up(n, tile_n)
    grid = (n_pad // tile_n,)

    x2d = x.reshape(n, cin)
    if n_pad != n:
        # Zero rows contribute exactly 0 to sum/sumsq (no bias), so stats stay exact.
        x2d = jnp.pad(x2d, ((0, n_pad - n), (0, 0)))
    x2d = x2d.astype(jnp.bfloat16)
    w_t = weight.T.astype(jnp.bfloat16)                  # (cin, cout)
    g2d = gamma.reshape(1, cout).astype(jnp.float32)
    b2d = beta.reshape(1, cout).astype(jnp.float32)

    # ---- Phase 1: matmul + batch-wide sum / sumsq reduction --------------------
    h, stats = pl.pallas_call(
        _matmul_stats_kernel,
        out_shape=(
            jax.ShapeDtypeStruct((n_pad, cout), jnp.float32),
            jax.ShapeDtypeStruct((2, cout), jnp.float32),
        ),
        grid=grid,
        in_specs=[
            pl.BlockSpec((tile_n, cin), lambda i: (i, 0)),   # x tiles stream in
            pl.BlockSpec((cin, cout), lambda i: (0, 0)),     # W resident in VMEM
        ],
        out_specs=(
            pl.BlockSpec((tile_n, cout), lambda i: (i, 0)),  # h tiles stream out
            pl.BlockSpec((2, cout), lambda i: (0, 0)),       # resident accumulator
        ),
        compiler_params=pltpu.CompilerParams(
            dimension_semantics=("arbitrary",),              # cross-tile reduction
        ),
        cost_estimate=pl.CostEstimate(
            flops=2 * n_pad * cin * cout,
            transcendentals=0,
            bytes_accessed=n_pad * cin * 2 + cin * cout * 2
            + n_pad * cout * 4 + 2 * cout * 4,
        ),
    )(x2d, w_t)

    # ---- Phase 2: normalize + ReLU (pure streaming, megacore parallel) ---------
    out2d = pl.pallas_call(
        functools.partial(_bn_relu_kernel, inv_n=1.0 / n),
        out_shape=jax.ShapeDtypeStruct((n_pad, cout), jnp.float32),
        grid=grid,
        in_specs=[
            pl.BlockSpec((2, cout), lambda i: (0, 0)),       # stats resident
            pl.BlockSpec((1, cout), lambda i: (0, 0)),       # gamma resident
            pl.BlockSpec((1, cout), lambda i: (0, 0)),       # beta resident
            pl.BlockSpec((tile_n, cout), lambda i: (i, 0)),  # h tiles stream in
        ],
        out_specs=pl.BlockSpec((tile_n, cout), lambda i: (i, 0)),
        input_output_aliases={3: 0},                         # normalize h in place
        compiler_params=pltpu.CompilerParams(
            dimension_semantics=("parallel",),
        ),
        cost_estimate=pl.CostEstimate(
            flops=3 * n_pad * cout,
            transcendentals=cout,
            bytes_accessed=2 * n_pad * cout * 4 + 4 * cout * 4,
        ),
    )(stats, g2d, b2d, h)

    return out2d[:n].reshape(kk, t, cout)


def _reference(x, weight, bias, gamma, beta):
    """Pure-JAX reference of the PyTorch forward (training-mode BN).

    Uses the same bf16 matmul precision as the kernel so tolerances stay tight;
    keeps the Linear bias and the two-pass centered variance to mirror PyTorch.
    """
    kk, t, cin = x.shape
    xb = x.reshape(kk * t, cin).astype(jnp.bfloat16)
    wb = weight.T.astype(jnp.bfloat16)
    h = jnp.dot(xb, wb, preferred_element_type=jnp.float32) + bias
    mean = h.mean(axis=0, keepdims=True)
    var = ((h - mean) ** 2).mean(axis=0, keepdims=True)  # biased
    y = (h - mean) * jax.lax.rsqrt(var + BN_EPS) * gamma + beta
    return jnp.maximum(y, 0.0).reshape(kk, t, -1)


if __name__ == "__main__":
    # Small shapes consistent with the module's forward: x is (kk, t, cin).
    kk, t, cin, cout = 2, 8, 4, 32

    key = jax.random.PRNGKey(0)
    kx, kw, kb = jax.random.split(key, 3)

    x = jax.random.normal(kx, (kk, t, cin), dtype=jnp.float32)

    # Deterministic synthetic parameters (PyTorch-style init ranges).
    bound = 1.0 / (cin ** 0.5)
    weight = jax.random.uniform(kw, (cout, cin), jnp.float32, -bound, bound)
    bias = jax.random.uniform(kb, (cout,), jnp.float32, -bound, bound)
    gamma = jnp.ones((cout,), jnp.float32)   # BatchNorm1d default init
    beta = jnp.zeros((cout,), jnp.float32)

    out = fcn_forward(x, weight, bias, gamma, beta)
    out = jax.block_until_ready(out)

    ref = _reference(x, weight, bias, gamma, beta)
    assert out.shape == (kk, t, cout), out.shape
    max_err = float(jnp.max(jnp.abs(out - ref)))
    assert jnp.allclose(out, ref, atol=1e-3, rtol=1e-3), max_err

    print("KERNEL_OK")
</pallas_src>

<mosaic_0001>
module attributes {stable_mosaic.version = 11 : i64} {
  func.func @_matmul_stats_kernel(%arg0: i32, %arg1: memref<16x4xbf16, #tpu.memory_space<vmem>>, %arg2: memref<4x32xbf16, #tpu.memory_space<vmem>>, %arg3: memref<16x32xf32, #tpu.memory_space<vmem>>, %arg4: memref<2x32xf32, #tpu.memory_space<vmem>>) attributes {dimension_semantics = [#tpu.dimension_semantics<arbitrary>], iteration_bounds = array<i64: 1>, scalar_prefetch = 0 : i64, scratch_operands = 0 : i64, tpu.core_type = #tpu.core_type<tc>, window_params = [{transform_indices = @transform_0, window_bounds = array<i64: 16, 4>}, {pipeline_mode = #tpu.pipeline_mode<synchronous>, transform_indices = @transform_1, window_bounds = array<i64: 4, 32>}, {transform_indices = @transform_2, window_bounds = array<i64: 16, 32>}, {pipeline_mode = #tpu.pipeline_mode<synchronous>, transform_indices = @transform_3, window_bounds = array<i64: 2, 32>}]} {
    %c0 = arith.constant 0 : index
    %c0_0 = arith.constant 0 : index
    %0 = vector.load %arg1[%c0, %c0_0] : memref<16x4xbf16, #tpu.memory_space<vmem>>, vector<16x4xbf16>
    %c0_1 = arith.constant 0 : index
    %c0_2 = arith.constant 0 : index
    %1 = vector.load %arg2[%c0_1, %c0_2] : memref<4x32xbf16, #tpu.memory_space<vmem>>, vector<4x32xbf16>
    %cst = arith.constant dense<0.000000e+00> : vector<16x32xf32>
    %2 = tpu.matmul %0, %1, %cst {dimension_numbers = #tpu.dot_dimension_numbers<[1], [0], [0], [1], [0, 0, 1, 1], [], []>} : vector<16x4xbf16>, vector<4x32xbf16>, vector<16x32xf32> -> vector<16x32xf32>
    %c0_3 = arith.constant 0 : index
    %c0_4 = arith.constant 0 : index
    %3 = vector.load %arg3[%c0_3, %c0_4] : memref<16x32xf32, #tpu.memory_space<vmem>>, vector<16x32xf32>
    tpu.vector_store %arg3[%c0_3, %c0_4], %2 {strides = array<i32>} : memref<16x32xf32, #tpu.memory_space<vmem>>, vector<16x32xf32>,
    %cst_5 = arith.constant dense<0.000000e+00> : vector<32xf32>
    %4 = vector.multi_reduction <add>, %2, %cst_5 [0] : vector<16x32xf32> to vector<32xf32>
    %5 = vector.shape_cast %4 : vector<32xf32> to vector<1x32xf32>
    %6 = arith.mulf %2, %2 : vector<16x32xf32>
    %cst_6 = arith.constant dense<0.000000e+00> : vector<32xf32>
    %7 = vector.multi_reduction <add>, %6, %cst_6 [0] : vector<16x32xf32> to vector<32xf32>
    %8 = vector.shape_cast %7 : vector<32xf32> to vector<1x32xf32>
    %c0_i32 = arith.constant 0 : i32
    %9 = arith.cmpi eq, %arg0, %c0_i32 : i32
    %10 = arith.extui %9 : i1 to i32
    %c0_i32_7 = arith.constant 0 : i32
    %11 = arith.cmpi ne, %10, %c0_i32_7 : i32
    scf.if %11 {
      %cst_12 = arith.constant 0.000000e+00 : f32
      %16 = vector.broadcast %cst_12 : f32 to vector<2x32xf32>
      %c0_13 = arith.constant 0 : index
      %c0_14 = arith.constant 0 : index
      %17 = vector.load %arg4[%c0_13, %c0_14] : memref<2x32xf32, #tpu.memory_space<vmem>>, vector<2x32xf32>
      tpu.vector_store %arg4[%c0_13, %c0_14], %16 {strides = array<i32>} : memref<2x32xf32, #tpu.memory_space<vmem>>, vector<2x32xf32>,
    } else {
    }
    %c0_8 = arith.constant 0 : index
    %c0_9 = arith.constant 0 : index
    %12 = vector.load %arg4[%c0_8, %c0_9] : memref<2x32xf32, #tpu.memory_space<vmem>>, vector<2x32xf32>
    %13 = tpu.concatenate %5, %8 in 0 : vector<1x32xf32>, vector<1x32xf32> -> vector<2x32xf32>
    %14 = arith.addf %12, %13 : vector<2x32xf32>
    %c0_10 = arith.constant 0 : index
    %c0_11 = arith.constant 0 : index
    %15 = vector.load %arg4[%c0_10, %c0_11] : memref<2x32xf32, #tpu.memory_space<vmem>>, vector<2x32xf32>
    tpu.vector_store %arg4[%c0_10, %c0_11], %14 {strides = array<i32>} : memref<2x32xf32, #tpu.memory_space<vmem>>, vector<2x32xf32>,
    return
  }
  func.func @transform_0(%arg0: i32) -> (i32, i32) {
    %c0_i32 = arith.constant 0 : i32
    %c0_i32_0 = arith.constant 0 : i32
    return %arg0, %c0_i32 : i32, i32
  }
  func.func @transform_1(%arg0: i32) -> (i32, i32) {
    %c0_i32 = arith.constant 0 : i32
    %c0_i32_0 = arith.constant 0 : i32
    %c0_i32_1 = arith.constant 0 : i32
    return %c0_i32, %c0_i32_0 : i32, i32
  }
  func.func @transform_2(%arg0: i32) -> (i32, i32) {
    %c0_i32 = arith.constant 0 : i32
    %c0_i32_0 = arith.constant 0 : i32
    return %arg0, %c0_i32 : i32, i32
  }
  func.func @transform_3(%arg0: i32) -> (i32, i32) {
    %c0_i32 = arith.constant 0 : i32
    %c0_i32_0 = arith.constant 0 : i32
    %c0_i32_1 = arith.constant 0 : i32
    return %c0_i32, %c0_i32_0 : i32, i32
  }
}

module attributes {stable_mosaic.version = 11 : i64} {
  func.func @_bn_relu_kernel(%arg0: i32, %arg1: memref<2x32xf32, #tpu.memory_space<vmem>>, %arg2: memref<1x32xf32, #tpu.memory_space<vmem>>, %arg3: memref<1x32xf32, #tpu.memory_space<vmem>>, %arg4: memref<16x32xf32, #tpu.memory_space<vmem>>, %arg5: memref<16x32xf32, #tpu.memory_space<vmem>>) attributes {dimension_semantics = [#tpu.dimension_semantics<parallel>], iteration_bounds = array<i64: 1>, scalar_prefetch = 0 : i64, scratch_operands = 0 : i64, tpu.core_type = #tpu.core_type<tc>, window_params = [{pipeline_mode = #tpu.pipeline_mode<synchronous>, transform_indices = @transform_0, window_bounds = array<i64: 2, 32>}, {pipeline_mode = #tpu.pipeline_mode<synchronous>, transform_indices = @transform_1, window_bounds = array<i64: 1, 32>}, {pipeline_mode = #tpu.pipeline_mode<synchronous>, transform_indices = @transform_2, window_bounds = array<i64: 1, 32>}, {transform_indices = @transform_3, window_bounds = array<i64: 16, 32>}, {transform_indices = @transform_4, window_bounds = array<i64: 16, 32>}]} {
    %c0 = arith.constant 0 : index
    %c0_0 = arith.constant 0 : index
    %0 = vector.load %arg1[%c0, %c0_0] : memref<2x32xf32, #tpu.memory_space<vmem>>, vector<2x32xf32>
    %1 = vector.extract_strided_slice %0 {offsets = [0, 0], sizes = [1, 32], strides = [1, 1]} : vector<2x32xf32> to vector<1x32xf32>
    %cst = arith.constant 6.250000e-02 : f32
    %2 = vector.broadcast %cst : f32 to vector<1x32xf32>
    %3 = arith.mulf %1, %2 : vector<1x32xf32>
    %4 = vector.extract_strided_slice %0 {offsets = [1, 0], sizes = [1, 32], strides = [1, 1]} : vector<2x32xf32> to vector<1x32xf32>
    %cst_1 = arith.constant 6.250000e-02 : f32
    %5 = vector.broadcast %cst_1 : f32 to vector<1x32xf32>
    %6 = arith.mulf %4, %5 : vector<1x32xf32>
    %7 = arith.mulf %3, %3 : vector<1x32xf32>
    %8 = arith.subf %6, %7 : vector<1x32xf32>
    %cst_2 = arith.constant 9.99999974E-6 : f32
    %9 = vector.broadcast %cst_2 : f32 to vector<1x32xf32>
    %10 = arith.addf %8, %9 : vector<1x32xf32>
    %11 = math.rsqrt %10 : vector<1x32xf32>
    %c0_3 = arith.constant 0 : index
    %c0_4 = arith.constant 0 : index
    %12 = vector.load %arg2[%c0_3, %c0_4] : memref<1x32xf32, #tpu.memory_space<vmem>>, vector<1x32xf32>
    %13 = arith.mulf %12, %11 : vector<1x32xf32>
    %c0_5 = arith.constant 0 : index
    %c0_6 = arith.constant 0 : index
    %14 = vector.load %arg3[%c0_5, %c0_6] : memref<1x32xf32, #tpu.memory_space<vmem>>, vector<1x32xf32>
    %15 = arith.mulf %3, %13 : vector<1x32xf32>
    %16 = arith.subf %14, %15 : vector<1x32xf32>
    %c0_7 = arith.constant 0 : index
    %c0_8 = arith.constant 0 : index
    %17 = vector.load %arg4[%c0_7, %c0_8] : memref<16x32xf32, #tpu.memory_space<vmem>>, vector<16x32xf32>
    %18 = vector.broadcast %13 : vector<1x32xf32> to vector<16x32xf32>
    %19 = arith.mulf %17, %18 : vector<16x32xf32>
    %20 = vector.broadcast %16 : vector<1x32xf32> to vector<16x32xf32>
    %21 = arith.addf %19, %20 : vector<16x32xf32>
    %cst_9 = arith.constant 0.000000e+00 : f32
    %22 = vector.broadcast %cst_9 : f32 to vector<16x32xf32>
    %23 = arith.maximumf %21, %22 : vector<16x32xf32>
    %c0_10 = arith.constant 0 : index
    %c0_11 = arith.constant 0 : index
    %24 = vector.load %arg5[%c0_10, %c0_11] : memref<16x32xf32, #tpu.memory_space<vmem>>, vector<16x32xf32>
    tpu.vector_store %arg5[%c0_10, %c0_11], %23 {strides = array<i32>} : memref<16x32xf32, #tpu.memory_space<vmem>>, vector<16x32xf32>,
    return
  }
  func.func @transform_0(%arg0: i32) -> (i32, i32) {
    %c0_i32 = arith.constant 0 : i32
    %c0_i32_0 = arith.constant 0 : i32
    %c0_i32_1 = arith.constant 0 : i32
    return %c0_i32, %c0_i32_0 : i32, i32
  }
  func.func @transform_1(%arg0: i32) -> (i32, i32) {
    %c0_i32 = arith.constant 0 : i32
    %c0_i32_0 = arith.constant 0 : i32
    %c0_i32_1 = arith.constant 0 : i32
    return %c0_i32, %c0_i32_0 : i32, i32
  }
  func.func @transform_2(%arg0: i32) -> (i32, i32) {
    %c0_i32 = arith.constant 0 : i32
    %c0_i32_0 = arith.constant 0 : i32
    %c0_i32_1 = arith.constant 0 : i32
    return %c0_i32, %c0_i32_0 : i32, i32
  }
  func.func @transform_3(%arg0: i32) -> (i32, i32) {
    %c0_i32 = arith.constant 0 : i32
    %c0_i32_0 = arith.constant 0 : i32
    return %arg0, %c0_i32 : i32, i32
  }
  func.func @transform_4(%arg0: i32) -> (i32, i32) {
    %c0_i32 = arith.constant 0 : i32
    %c0_i32_0 = arith.constant 0 : i32
    return %arg0, %c0_i32 : i32, i32
  }
}

</mosaic_0001>

<bundles_post_ra>
// kernel: fcn_forward.2
= control target key start
LH: loop header
LB: loop body
LE: loop exit
PB: predicated region body
PF: predicated region fallthrough
CT: control target
= control target key end

     0   :  { %vm98_vm0 = vcmask 254976   ;;  %vm26_vm1 = vcmask 1041408   ;;  %v127_v0 = vmov 0.0   ;;  %vm128_vm2 = vmmov 0   ;;  %s172_s3 = inlined_call_operand.vmem [shape: f32[2,32], index: 3, kind: output, shape index: {1}]   ;;  %s173_s1 = inlined_call_operand.vmem [shape: bf16[4,32], index: 1, kind: input, shape index: {}]   ;;  %s174_s0 = inlined_call_operand.vmem [shape: bf16[16,4], index: 0, kind: input, shape index: {}]   ;;  %s175_s2 = inlined_call_operand.vmem [shape: f32[16,32], index: 2, kind: output, shape index: {0}]  }
   0x1   :  { %118 = vmatprep.subr.bf16.mxu0 %v127_v0  ;;  %99 = vst.msk [vmem:[%s172_s3] sm:$0x3] %vm98_vm0, %v127_v0  ;;  %v16_v1 = vld [vmem:[%s173_s1] sm:$0x3]  ;;  %120 = vmatprep.mubr.msk.bf16.mxu0 %vm128_vm2, %v127_v0  ;;  %vm22_vm3 = vcmask 31744   ;;  %vm71_vm4 = vcmask 261120  }
   0x2   :  { %v28_v2 = vsel %vm26_vm1, %v16_v1, 0  ;;  %v126_v3 = vld [vmem:[%s174_s0] sm:$0xff]   ;;  %vm101_vm5 = vcmask 1040384  }
   0x3   :  { %119 = vmatpush3.bf16.msra.mxu0 %v28_v2 }
   0x6   :  { %121 = vmatmul.mubr.msk.bf16.vlgmr.msra.gmra.mrb[0].mxu0 %vm22_vm3, %v126_v3 }
   0x8   :  { %v100_v26 = vld [vmem:[%s172_s3] sm:$0x3] }
  0xd9   :  { %v64_v4 = vpop.f32.mrb[0].mxu0 }
  0xda   :  { %72 = vst.msk [vmem:[%s175_s2] sm:$0xff] %vm71_vm4, %v64_v4  ;;  %v83_v5 = vmul.f32 %v64_v4, %v64_v4  ;;  %v122_v6 = vpop.f32.mrb[1].mxu0  ;;  %v74_v8 = vsel %vm71_vm4, %v64_v4, 0.0 }
  0xdb   :  { %v67_v7 = vpop.f32.mrb[2].mxu0 }
  0xdc   :  { %73 = vst.msk [vmem:[%s175_s2 + $0x8] sm:$0xff] %vm71_vm4, %v67_v7  ;;  %v75_v9 = vsel %vm71_vm4, %v67_v7, 0.0  ;;  %v84_v10 = vmul.f32 %v67_v7, %v67_v7  ;;  %v123_v11 = vpop.f32.mrb[3].mxu0  ;;  %v85_v13 = vsel %vm71_vm4, %v83_v5, 0.0 }
  0xdd   :  { %v76_v12 = vadd.f32 %v75_v9, %v74_v8 }
  0xde   :  { %v86_v14 = vsel %vm71_vm4, %v84_v10, 0.0 }
  0xdf   :  { %v77_v15 = vrot.slane %v76_v12, 4  ;;  %v87_v16 = vadd.f32 %v86_v14, %v85_v13 }
  0xe1   :  { %v78_v17 = vadd.f32 %v77_v15, %v76_v12  ;;  %v88_v18 = vrot.slane %v87_v16, 4 }
  0xe3   :  { %v79_v19 = vrot.slane %v78_v17, 2  ;;  %v89_v20 = vadd.f32 %v88_v18, %v87_v16 }
  0xe5   :  { %v80_v21 = vadd.f32 %v79_v19, %v78_v17  ;;  %v90_v22 = vrot.slane %v89_v20, 2 }
  0xe7   :  { %v81_v23 = vrot.slane %v80_v21, 1  ;;  %v91_v24 = vadd.f32 %v90_v22, %v89_v20 }
  0xe9   :  { %v92_v25 = vrot.slane %v91_v24, 1  ;;  %v82_v27 = vadd.f32 %v81_v23, %v80_v21 }
  0xeb   :  { %v93_v28 = vadd.f32 %v92_v25, %v91_v24 }
  0xed   :  { %v102_v29 = vsel %vm101_vm5, %v82_v27, %v93_v28 }
  0xee   :  { %v103_v30 = vadd.f32 %v102_v29, %v100_v26 }
  0xf0   :  { %105 = vst.msk [vmem:[%s172_s3] sm:$0x3] %vm98_vm0, %v103_v30 }

// kernel: fcn_forward.3
= control target key start
LH: loop header
LB: loop body
LE: loop exit
PB: predicated region body
PF: predicated region fallthrough
CT: control target
= control target key end

     0   :  { %v78_v6 = vmov 1966171168   ;;  %v31_v8 = vlaneseq  ;;  %vm68_vm0 = vcmask 261120   ;;  %s125_s0 = inlined_call_operand.vmem [shape: f32[2,32], index: 0, kind: input, shape index: {}]   ;;  %s126_s1 = inlined_call_operand.vmem [shape: f32[1,32], index: 1, kind: input, shape index: {}]   ;;  %s127_s2 = inlined_call_operand.vmem [shape: f32[1,32], index: 2, kind: input, shape index: {}]   ;;  %s128_s3 = inlined_call_operand.vmem [shape: f32[16,32], index: 3, kind: input, shape index: {}, may-alias: {3,4}]   ;;  %s129_s4 = inlined_call_operand.vmem [shape: f32[16,32], index: 4, kind: output, shape index: {}, may-alias: {3,4}]  }
   0x1   :  { %v17_v0 = vld [vmem:[%s125_s0] sm:$0x3]  ;;  %v29_v7 = vunpack.c.l.s4 %v78_v6  ;;  %v49_v21 = vld [vmem:[%s128_s3 + $0x8] sm:$0xff] }
   0x2   :  { %v18_v1 = vmul.f32 0.0625, %v17_v0  ;;  %v32_v10 = vshrl.u32 %v31_v8, 7  ;;  %v26_v15 = vld [vmem:[%s126_s1] sm:$0x1] }
   0x3   :  { %v30_v9 = vunpack.c.0.s8 %v29_v7  ;;  %v45_v19 = vld [vmem:[%s127_s2] sm:$0x1] }
   0x4   :  { %v19_v2 = vmul.f32 %v18_v1, %v18_v1  ;;  %v53_v17 = vsub.s32 0, %v32_v10  ;;  %v48_v20 = vld [vmem:[%s128_s3] sm:$0xff] }
   0x5   :  { %v33_v11 = vsub.s32 %v30_v9, %v32_v10 }
   0x6   :  { %v21_v3 = vrot.slane %v19_v2, 7 }
   0x8   :  { %v23_v4 = vsub.f32 %v18_v1, %v21_v3 }
   0xa   :  { %v24_v5 = vadd.f32 1e-05, %v23_v4 }
   0xc   :  { %76 = vrsqrt.f32 %v24_v5 }
  0x16   :  { %v77_v12 = vpop.eup %76 }
  0x17   :  { %v34_v13 = vrot.slane %v77_v12, %v33_v11 }
  0x19   :  { %v35_v14 = vcombine.high %v34_v13, %v34_v13 }
  0x1b   :  { %v42_v16 = vrot.slane %v35_v14, %v33_v11 }
  0x1d   :  { %v44_v18 = vmul.f32 %v42_v16, %v26_v15 }
  0x1f   :  { %v46_v22 = vmul.f32 %v44_v18, %v18_v1  ;;  %v54_v23 = vrot.slane %v44_v18, %v53_v17 }
  0x21   :  { %v47_v24 = vsub.f32 %v45_v19, %v46_v22  ;;  %v56_v25 = vmul.f32 %v54_v23, %v48_v20  ;;  %v57_v26 = vmul.f32 %v54_v23, %v49_v21 }
  0x23   :  { %v62_v27 = vrot.slane %v47_v24, %v53_v17 }
  0x25   :  { %v64_v28 = vadd.f32 %v62_v27, %v56_v25  ;;  %v65_v29 = vadd.f32 %v62_v27, %v57_v26 }
  0x27   :  { %v66_v30 = vmax.f32 %v64_v28, 0.0  ;;  %v67_v31 = vmax.f32 %v65_v29, 0.0 }
  0x29   :  { %69 = vst.msk [vmem:[%s129_s4] sm:$0xff] %vm68_vm0, %v66_v30  ;;  %70 = vst.msk [vmem:[%s129_s4 + $0x8] sm:$0xff] %vm68_vm0, %v67_v31 }

</bundles_post_ra>
